<compile_context>
chip_gen: v7x
topology: tpu7x:2x2x1
jax: 0.10.0
libtpu: 0.0.40
codegen_flags: <defaults>
</compile_context>

<pallas_src>
import functools

import jax
import jax.numpy as jnp
from jax.experimental import pallas as pl
from jax.experimental.pallas import tpu as pltpu


def _residual_linear_kernel(x_ref, w_ref, b_ref, o_ref, acc_ref, *, mm_dtype):
    # x_ref: (tm, t)   w_ref: (t, t)   b_ref: (1, t)
    # o_ref: (tm, t)   acc_ref: (tm, t) f32 scratch
    j = pl.program_id(1)
    k = pl.program_id(2)

    @pl.when(k == 0)
    def _():
        # Initialise the accumulator with the bias (saves a zero-fill plus a
        # broadcast add in the epilogue).
        acc_ref[...] = jnp.broadcast_to(
            b_ref[...].astype(jnp.float32), acc_ref.shape
        )

    # Per-tile cast to the MXU dtype (bf16 by default); f32 accumulate.
    acc_ref[...] += jnp.dot(
        x_ref[...].astype(mm_dtype),
        w_ref[...].astype(mm_dtype),
        preferred_element_type=jnp.float32,
    )

    # Residual: because tk == tn and Dout == D, the residual tile for output
    # block (i, j) is exactly the LHS x tile seen at K step k == j.  Add it
    # once, in full input precision, from the tile already in VMEM.
    @pl.when(k == j)
    def _():
        acc_ref[...] += x_ref[...].astype(jnp.float32)

    @pl.when(k == pl.num_programs(2) - 1)
    def _():
        o_ref[...] = acc_ref[...].astype(o_ref.dtype)


def _round_up(x, m):
    return ((x + m - 1) // m) * m


def _pick_feature_tile(dim, target, align=128):
    """Largest multiple of `align` that is <= target and divides `dim`."""
    assert dim % align == 0
    t = max(align, (min(target, dim) // align) * align)
    while dim % t != 0:
        t -= align
    return t


def _pick_m_tile(M, target):
    """Pick (tm, M_pad).

    Prefers an MXU/sublane-aligned tm that divides round_up(M, 8) (=> at most
    7 padded rows, usually zero), and only falls back to padding M up to a
    multiple of the target tile when the divisors are pathological.
    """
    M8 = _round_up(M, 8)
    target = max(8, min(_round_up(target, 8), M8))
    for align in (256, 128, 8):
        if target >= align and M8 % align == 0:
            t = (target // align) * align
            while M8 % t != 0:
                t -= align
            if t >= max(align, target // 2):
                return t, M8
    # Divisor search gave something too small -> pad M to a multiple of target.
    return target, _round_up(M, target)


def residual_linear(x, w, b, *, tm=512, tn=1024, tk=1024,
                    matmul_dtype=jnp.bfloat16):
    """Computes fn(x) + x with fn(x) = x @ w + b.

    x: (B, N, D), w: (D, D), b: (D,).  Dout == D (required by the residual).
    tm/tn/tk are tuning knobs; the folded-residual path requires the N-output
    and K-reduction feature tiles to match, so a single feature tile
    t = min(tn, tk) (clamped to a divisor of D) is used for both.
    matmul_dtype: MXU operand dtype (cast per-tile in-kernel; f32 accumulate).
    Pass jnp.float32 for exact f32 matmul.
    """
    B, N, D = x.shape
    Din, Dout = w.shape
    assert Din == D and Dout == D, "Residual(Linear) requires a square weight"
    assert D % 128 == 0, "feature dim must be a multiple of 128 (lane width)"
    assert b.shape == (Dout,)

    mm_dtype = jnp.dtype(matmul_dtype) if matmul_dtype is not None else x.dtype

    M = B * N

    # --- tile selection ----------------------------------------------------
    t = _pick_feature_tile(D, min(tn, tk), 128)   # shared N-out / K tile
    tm, M_pad = _pick_m_tile(M, tm)

    x2 = x.reshape(M, D)
    if M_pad != M:
        # Fallback only (awkward M); typical shapes take the no-pad path.
        x2 = jnp.pad(x2, ((0, M_pad - M), (0, 0)))
    b2 = b.reshape(1, Dout)

    n_m, n_n, n_k = M_pad // tm, D // t, D // t
    grid = (n_m, n_n, n_k)

    # --- VMEM budget (double-buffered tiles + f32 accumulator) --------------
    vmem_est = (
        2 * tm * t * x2.dtype.itemsize      # x (matmul LHS + folded residual)
        + 2 * t * t * w.dtype.itemsize      # weight tile
        + 2 * 1 * t * b2.dtype.itemsize     # bias tile
        + 2 * tm * t * x.dtype.itemsize     # output tile
        + tm * t * 4                        # f32 accumulator scratch
    )
    try:
        vmem_cap = int(getattr(pltpu.get_tpu_info(), "vmem_capacity_bytes",
                               64 * 1024 * 1024))
    except Exception:  # pragma: no cover - conservative fallback
        vmem_cap = 64 * 1024 * 1024
    vmem_limit = int(min(vmem_cap * 0.8,
                         max(32 * 1024 * 1024, vmem_est * 1.4)))

    # Real DMA traffic: LHS re-streamed once per N-tile, W once per M-tile.
    cost = pl.CostEstimate(
        flops=2 * M_pad * D * Dout,
        transcendentals=0,
        bytes_accessed=int(
            n_n * M_pad * D * x2.dtype.itemsize
            + n_m * D * Dout * w.dtype.itemsize
            + n_m * n_n * t * b2.dtype.itemsize
            + M_pad * Dout * x.dtype.itemsize
        ),
    )

    kernel = functools.partial(_residual_linear_kernel, mm_dtype=mm_dtype)

    out2 = pl.pallas_call(
        kernel,
        out_shape=jax.ShapeDtypeStruct((M_pad, Dout), x.dtype),
        grid_spec=pltpu.PrefetchScalarGridSpec(
            num_scalar_prefetch=0,
            grid=grid,
            in_specs=[
                pl.BlockSpec((tm, t), lambda i, j, k: (i, k)),  # x (LHS + res)
                pl.BlockSpec((t, t), lambda i, j, k: (k, j)),   # weight
                pl.BlockSpec((1, t), lambda i, j, k: (0, j)),   # bias
            ],
            out_specs=pl.BlockSpec((tm, t), lambda i, j, k: (i, j)),
            scratch_shapes=[pltpu.VMEM((tm, t), jnp.float32)],
        ),
        compiler_params=pltpu.CompilerParams(
            dimension_semantics=("parallel", "parallel", "arbitrary"),
            vmem_limit_bytes=vmem_limit,
        ),
        cost_estimate=cost,
    )(x2, w, b2)

    if M_pad != M:
        out2 = out2[:M]
    return out2.reshape(B, N, Dout)


if __name__ == "__main__":
    key = jax.random.PRNGKey(0)

    def run_case(B, N, D, *, matmul_dtype, atol, rtol, **kw):
        kx, kw_, kb = jax.random.split(
            jax.random.fold_in(key, B * 100003 + N * 131 + D), 3
        )
        x = jax.random.normal(kx, (B, N, D), dtype=jnp.float32)
        w = jax.random.normal(kw_, (D, D), dtype=jnp.float32) * 0.02
        b = jax.random.normal(kb, (D,), dtype=jnp.float32) * 0.01

        out = residual_linear(x, w, b, matmul_dtype=matmul_dtype, **kw)
        out = jax.block_until_ready(out)

        # Reference: Residual semantics fn(x) + x.
        ref = jnp.einsum("bnd,de->bne", x, w) + b + x
        assert out.shape == x.shape and out.dtype == x.dtype
        err = float(jnp.max(jnp.abs(out - ref)))
        assert jnp.allclose(out, ref, atol=atol, rtol=rtol), err

    # Exact-precision path (f32 MXU), single-tile shapes.
    run_case(2, 8, 128, matmul_dtype=jnp.float32, atol=1e-4, rtol=1e-4)
    # Default bf16 MXU path; exercises M/N/K tiling, accumulator init with
    # bias, and the folded-residual add (bf16 tolerance is quantization, not
    # a kernel bug).
    run_case(2, 96, 256, matmul_dtype=jnp.bfloat16, atol=2e-2, rtol=2e-2,
             tm=64, tn=128, tk=128)

    print("KERNEL_OK")
</pallas_src>

<mosaic_0001>
module attributes {stable_mosaic.version = 11 : i64} {
  func.func @_residual_linear_kernel(%arg0: i32, %arg1: i32, %arg2: i32, %arg3: memref<16x128xf32, #tpu.memory_space<vmem>>, %arg4: memref<128x128xf32, #tpu.memory_space<vmem>>, %arg5: memref<1x128xf32, #tpu.memory_space<vmem>>, %arg6: memref<16x128xf32, #tpu.memory_space<vmem>>, %arg7: memref<16x128xf32, #tpu.memory_space<vmem>>) attributes {dimension_semantics = [#tpu.dimension_semantics<parallel>, #tpu.dimension_semantics<parallel>, #tpu.dimension_semantics<arbitrary>], iteration_bounds = array<i64: 1, 1, 1>, scalar_prefetch = 0 : i64, scratch_operands = 1 : i64, tpu.core_type = #tpu.core_type<tc>, window_params = [{transform_indices = @transform_0, window_bounds = array<i64: 16, 128>}, {transform_indices = @transform_1, window_bounds = array<i64: 128, 128>}, {transform_indices = @transform_2, window_bounds = array<i64: 1, 128>}, {transform_indices = @transform_3, window_bounds = array<i64: 16, 128>}]} {
    %c0_i32 = arith.constant 0 : i32
    %0 = arith.cmpi eq, %arg2, %c0_i32 : i32
    %1 = arith.extui %0 : i1 to i32
    %c0_i32_0 = arith.constant 0 : i32
    %2 = arith.cmpi ne, %1, %c0_i32_0 : i32
    scf.if %2 {
      %c0_11 = arith.constant 0 : index
      %c0_12 = arith.constant 0 : index
      %15 = vector.load %arg5[%c0_11, %c0_12] : memref<1x128xf32, #tpu.memory_space<vmem>>, vector<1x128xf32>
      %16 = vector.shape_cast %15 : vector<1x128xf32> to vector<1x128xf32>
      %17 = vector.broadcast %16 : vector<1x128xf32> to vector<16x128xf32>
      %c0_13 = arith.constant 0 : index
      %c0_14 = arith.constant 0 : index
      %18 = vector.load %arg7[%c0_13, %c0_14] : memref<16x128xf32, #tpu.memory_space<vmem>>, vector<16x128xf32>
      tpu.vector_store %arg7[%c0_13, %c0_14], %17 {strides = array<i32>} : memref<16x128xf32, #tpu.memory_space<vmem>>, vector<16x128xf32>,
    } else {
    }
    %c0 = arith.constant 0 : index
    %c0_1 = arith.constant 0 : index
    %3 = vector.load %arg7[%c0, %c0_1] : memref<16x128xf32, #tpu.memory_space<vmem>>, vector<16x128xf32>
    %c0_2 = arith.constant 0 : index
    %c0_3 = arith.constant 0 : index
    %4 = vector.load %arg3[%c0_2, %c0_3] : memref<16x128xf32, #tpu.memory_space<vmem>>, vector<16x128xf32>
    %c0_4 = arith.constant 0 : index
    %c0_5 = arith.constant 0 : index
    %5 = vector.load %arg4[%c0_4, %c0_5] : memref<128x128xf32, #tpu.memory_space<vmem>>, vector<128x128xf32>
    %cst = arith.constant dense<0.000000e+00> : vector<16x128xf32>
    %6 = tpu.matmul %4, %5, %cst {dimension_numbers = #tpu.dot_dimension_numbers<[1], [0], [0], [1], [0, 0, 1, 1], [], []>} : vector<16x128xf32>, vector<128x128xf32>, vector<16x128xf32> -> vector<16x128xf32>
    %7 = arith.addf %3, %6 : vector<16x128xf32>
    %c0_6 = arith.constant 0 : index
    %c0_7 = arith.constant 0 : index
    %8 = vector.load %arg7[%c0_6, %c0_7] : memref<16x128xf32, #tpu.memory_space<vmem>>, vector<16x128xf32>
    tpu.vector_store %arg7[%c0_6, %c0_7], %7 {strides = array<i32>} : memref<16x128xf32, #tpu.memory_space<vmem>>, vector<16x128xf32>,
    %9 = arith.cmpi eq, %arg2, %arg1 : i32
    %10 = arith.extui %9 : i1 to i32
    %c0_i32_8 = arith.constant 0 : i32
    %11 = arith.cmpi ne, %10, %c0_i32_8 : i32
    scf.if %11 {
      %c0_11 = arith.constant 0 : index
      %c0_12 = arith.constant 0 : index
      %15 = vector.load %arg7[%c0_11, %c0_12] : memref<16x128xf32, #tpu.memory_space<vmem>>, vector<16x128xf32>
      %c0_13 = arith.constant 0 : index
      %c0_14 = arith.constant 0 : index
      %16 = vector.load %arg3[%c0_13, %c0_14] : memref<16x128xf32, #tpu.memory_space<vmem>>, vector<16x128xf32>
      %17 = arith.addf %15, %16 : vector<16x128xf32>
      %c0_15 = arith.constant 0 : index
      %c0_16 = arith.constant 0 : index
      %18 = vector.load %arg7[%c0_15, %c0_16] : memref<16x128xf32, #tpu.memory_space<vmem>>, vector<16x128xf32>
      tpu.vector_store %arg7[%c0_15, %c0_16], %17 {strides = array<i32>} : memref<16x128xf32, #tpu.memory_space<vmem>>, vector<16x128xf32>,
    } else {
    }
    %c0_i32_9 = arith.constant 0 : i32
    %12 = arith.cmpi eq, %arg2, %c0_i32_9 : i32
    %13 = arith.extui %12 : i1 to i32
    %c0_i32_10 = arith.constant 0 : i32
    %14 = arith.cmpi ne, %13, %c0_i32_10 : i32
    scf.if %14 {
      %c0_11 = arith.constant 0 : index
      %c0_12 = arith.constant 0 : index
      %15 = vector.load %arg7[%c0_11, %c0_12] : memref<16x128xf32, #tpu.memory_space<vmem>>, vector<16x128xf32>
      %c0_13 = arith.constant 0 : index
      %c0_14 = arith.constant 0 : index
      %16 = vector.load %arg6[%c0_13, %c0_14] : memref<16x128xf32, #tpu.memory_space<vmem>>, vector<16x128xf32>
      tpu.vector_store %arg6[%c0_13, %c0_14], %15 {strides = array<i32>} : memref<16x128xf32, #tpu.memory_space<vmem>>, vector<16x128xf32>,
    } else {
    }
    return
  }
  func.func @transform_0(%arg0: i32, %arg1: i32, %arg2: i32) -> (i32, i32) {
    %c0_i32 = arith.constant 0 : i32
    return %arg0, %arg2 : i32, i32
  }
  func.func @transform_1(%arg0: i32, %arg1: i32, %arg2: i32) -> (i32, i32) {
    %c0_i32 = arith.constant 0 : i32
    return %arg2, %arg1 : i32, i32
  }
  func.func @transform_2(%arg0: i32, %arg1: i32, %arg2: i32) -> (i32, i32) {
    %c0_i32 = arith.constant 0 : i32
    %c0_i32_0 = arith.constant 0 : i32
    return %c0_i32, %arg1 : i32, i32
  }
  func.func @transform_3(%arg0: i32, %arg1: i32, %arg2: i32) -> (i32, i32) {
    %c0_i32 = arith.constant 0 : i32
    return %arg0, %arg1 : i32, i32
  }
}

</mosaic_0001>

<bundles_post_ra>
// kernel: tpu_custom_call.1
= control target key start
LH: loop header
LB: loop body
LE: loop exit
PB: predicated region body
PF: predicated region fallthrough
CT: control target
= control target key end

     0   :  { %8 = vsyncpa [#allocation4], 0  ;;  %s428_s0 = inlined_call_operand.hbm [shape: f32[16,128], index: 0, kind: input, shape index: {}]   ;;  %s429_s1 = inlined_call_operand.hbm [shape: f32[128,128], index: 1, kind: input, shape index: {}]   ;;  %s430_s2 = inlined_call_operand.vmem [shape: f32[1,128], index: 2, kind: input, shape index: {}]   ;;  %s431_s3 = inlined_call_operand.hbm [shape: f32[16,128], index: 3, kind: output, shape index: {}]  }
   0x1   :  { %9 = vsyncpa [#allocation7], 0 }
   0x2   :  { %10 = vsyncpa [#allocation5], 0  ;;  %s355_s12 = smov [#allocation3]   ;;  %s283_s16 = scalar_lea.hbm %s428_s0, 256 }
   0x3   :  { %s16_s13 = sshll.u32 %s355_s12, 4  ;;  %p284_p0 = scmp.ne.s32.totalorder %s428_s0, %s283_s16  ;;  %s17_s13 = int_to_ptr.vmem [resolvable:$true] %s16_s13 }
   0x4   :  { %p287_p1 = scmp.lt.u32.totalorder %s283_s16, %s428_s0 }
   0x6   :  { %p289_p2 = pnand %p287_p1, %p284_p0 }
   0x8   :  { %292 = shalt.err (!%p289_p2)
}
   0x9   :  { %s293_s21 = scalar_lea.vmem %s17_s13, 256  ;;  %p298_p4 = scmp.lt.s32.totalorder %s17_s13, %s17_s13 }
   0xa   :  { %p294_p3 = scmp.ne.s32.totalorder %s17_s13, %s293_s21  ;;  %p299_p5 = scmp.lt.s32.totalorder %s293_s21, %s293_s21 }
   0xc   :  { %p300_p6 = por %p299_p5, %p298_p4 }
   0xe   :  { %p301_p7 = pnand %p300_p6, %p294_p3 }
  0x10   :  { %304 = shalt.err (!%p301_p7)
}
  0x11   :  { %s356_s22 = smov 128   ;;  %s357_s23 = smov 8  }
  0x12   :  { %22 = dma.hbm_to_vmem [thread:$0]  %s428_s0, 256, %s17_s13, [#allocation4], %s356_s22, %s356_s22, %s357_s23  }
  0x13   :  { %s358_s26 = smov [#allocation6]   ;;  %s305_s30 = scalar_lea.hbm %s429_s1, 2048 }
  0x14   :  { %s28_s27 = sshll.u32 %s358_s26, 4  ;;  %p306_p8 = scmp.ne.s32.totalorder %s429_s1, %s305_s30  ;;  %s29_s27 = int_to_ptr.vmem [resolvable:$true] %s28_s27 }
  0x15   :  { %p309_p9 = scmp.lt.u32.totalorder %s305_s30, %s429_s1 }
  0x17   :  { %p311_p10 = pnand %p309_p9, %p306_p8 }
  0x19   :  { %314 = shalt.err (!%p311_p10)
}
  0x1a   :  { %s315_s8 = scalar_lea.vmem %s29_s27, 2048  ;;  %p320_p12 = scmp.lt.s32.totalorder %s29_s27, %s29_s27 }
  0x1b   :  { %p316_p11 = scmp.ne.s32.totalorder %s29_s27, %s315_s8  ;;  %p321_p13 = scmp.lt.s32.totalorder %s315_s8, %s315_s8 }
  0x1d   :  { %p322_p0 = por %p321_p13, %p320_p12 }
  0x1f   :  { %p323_p1 = pnand %p322_p0, %p316_p11 }
  0x21   :  { %326 = shalt.err (!%p323_p1)
}
  0x22   :  { %34 = dma.hbm_to_vmem [thread:$0]  %s429_s1, 2048, %s29_s27, [#allocation7], %s356_s22, %s356_s22, %s357_s23  }
  0x23   :  { %349 = dma.done.wait [#allocation4], 256  }
  0x24   :  { %350 = vsyncadd [#allocation4], 4294967040 }
  0x25   :  { %351 = dma.done.wait [#allocation7], 2048  }
  0x26   :  { %352 = vsyncadd [#allocation7], 4294965248  ;;  %v60_v0 = vld [vmem:[#allocation6] sm:$0xff]  ;;  %v61_v1 = vld [vmem:[#allocation6 + $0x8] sm:$0xff]  ;;  %s359_s11 = smov [#allocation8]  }
  0x27   :  { %v62_v2 = vld [vmem:[#allocation6 + $0x10] sm:$0xff]  ;;  %v246_v3 = vpack.c.bf16 %v61_v1, %v60_v0  ;;  %v63_v4 = vld [vmem:[#allocation6 + $0x18] sm:$0xff]  ;;  %v64_v6 = vld [vmem:[#allocation6 + $0x20] sm:$0xff]  ;;  %s179_s12 = sshll.u32 %s359_s11, 4  ;;  %s180_s12 = int_to_ptr.vmem [resolvable:$true] %s179_s12 }
  0x28   :  { %v250_v5 = vpack.c.bf16 %v63_v4, %v62_v2  ;;  %v65_v7 = vld [vmem:[#allocation6 + $0x28] sm:$0xff]  ;;  %v58_v9 = vld [vmem:[#allocation3] sm:$0xff]  ;;  %v67_v11 = vld [vmem:[#allocation6 + $0x38] sm:$0xff]  ;;  %s327_s13 = scalar_lea.vmem %s180_s12, 256  ;;  %p332_p3 = scmp.lt.s32.totalorder %s180_s12, %s180_s12 }
  0x29   :  { %247 = vmatprep.subr.bf16.mxu0 %v246_v3  ;;  %v254_v8 = vpack.c.bf16 %v65_v7, %v64_v6  ;;  %v66_v10 = vld [vmem:[#allocation6 + $0x30] sm:$0xff]  ;;  %243 = vmatprep.mubr.f32.mxu0 %v58_v9  ;;  %v68_v13 = vld [vmem:[#allocation6 + $0x40] sm:$0xff]  ;;  %v69_v14 = vld [vmem:[#allocation6 + $0x48] sm:$0xff]  ;;  %p328_p2 = scmp.ne.s32.totalorder %s180_s12, %s327_s13  ;;  %p333_p4 = scmp.lt.s32.totalorder %s327_s13, %s327_s13 }
  0x2a   :  { %249 = vmatpush3.bf16.msra.mxu0 %v246_v3  ;;  %v258_v12 = vpack.c.bf16 %v67_v11, %v66_v10  ;;  %v262_v15 = vpack.c.bf16 %v69_v14, %v68_v13  ;;  %v70_v16 = vld [vmem:[#allocation6 + $0x50] sm:$0xff]  ;;  %v71_v17 = vld [vmem:[#allocation6 + $0x58] sm:$0xff]  ;;  %v72_v19 = vld [vmem:[#allocation6 + $0x60] sm:$0xff] }
  0x2b   :  { %251 = vmatprep.subr.bf16.mxu0 %v250_v5  ;;  %v266_v18 = vpack.c.bf16 %v71_v17, %v70_v16  ;;  %v73_v20 = vld [vmem:[#allocation6 + $0x68] sm:$0xff]  ;;  %v74_v22 = vld [vmem:[#allocation6 + $0x70] sm:$0xff]  ;;  %v75_v23 = vld [vmem:[#allocation6 + $0x78] sm:$0xff]  ;;  %p334_p5 = por %p333_p4, %p332_p3 }
  0x2c   :  { %v270_v21 = vpack.c.bf16 %v73_v20, %v72_v19  ;;  %v274_v24 = vpack.c.bf16 %v75_v23, %v74_v22  ;;  %v59_v25 = vld [vmem:[#allocation3 + $0x8] sm:$0xff]  ;;  %v192_v26 = vld [vmem:[%s430_s2] ss:$0 sm:$0xff] }
  0x2d   :  { %p335_p6 = pnand %p334_p5, %p328_p2 }
  0x2e   :  { %253 = vmatpush3.bf16.msra.mxu0 %v250_v5 }
  0x2f   :  { %255 = vmatprep.subr.bf16.mxu0 %v254_v8 }
  0x32   :  { %257 = vmatpush3.bf16.msra.mxu0 %v254_v8 }
  0x33   :  { %259 = vmatprep.subr.bf16.mxu0 %v258_v12 }
  0x36   :  { %261 = vmatpush3.bf16.msra.mxu0 %v258_v12 }
  0x37   :  { %263 = vmatprep.subr.bf16.mxu0 %v262_v15 }
  0x3a   :  { %265 = vmatpush3.bf16.msra.mxu0 %v262_v15 }
  0x3b   :  { %267 = vmatprep.subr.bf16.mxu0 %v266_v18 }
  0x3e   :  { %269 = vmatpush3.bf16.msra.mxu0 %v266_v18 }
  0x3f   :  { %271 = vmatprep.subr.bf16.mxu0 %v270_v21 }
  0x42   :  { %273 = vmatpush3.bf16.msra.mxu0 %v270_v21 }
  0x43   :  { %275 = vmatprep.subr.bf16.mxu0 %v274_v24 }
  0x46   :  { %277 = vmatpush3.bf16.msra.mxu0 %v274_v24 }
  0x49   :  { %244 = vmatmul.mubr.f32.vlgmr.msra.gmra.mrb[0].mxu0 %v59_v25 }
 0x11c   :  { %v245_v27 = vpop.f32.mrb[0].mxu0 }
 0x11d   :  { %v152_v28 = vadd.f32 %v245_v27, %v192_v26  ;;  %v142_v29 = vpop.f32.mrb[1].mxu0 }
 0x11e   :  { %v151_v30 = vadd.f32 %v192_v26, %v142_v29 }
 0x11f   :  { %v164_v31 = vadd.f32 %v152_v28, %v59_v25 }
 0x120   :  { %v163_v32 = vadd.f32 %v151_v30, %v58_v9 }
 0x121   :  { %173 = vst [vmem:[#allocation8 + $0x8] sm:$0xff] %v164_v31 }
 0x122   :  { %172 = vst [vmem:[#allocation8] sm:$0xff] %v163_v32 }
 0x123   :  { %338 = shalt.err (!%p335_p6)
}
 0x124   :  { %s339_s15 = scalar_lea.hbm %s431_s3, 256 }
 0x125   :  { %p340_p7 = scmp.ne.s32.totalorder %s431_s3, %s339_s15  ;;  %p343_p8 = scmp.lt.u32.totalorder %s339_s15, %s431_s3 }
 0x127   :  { %p345_p9 = pnand %p343_p8, %p340_p7 }
 0x129   :  { %348 = shalt.err (!%p345_p9)
}
 0x12a   :  { %185 = dma.vmem_to_hbm [thread:$0]  %s180_s12, 256, %s431_s3, [#allocation5], %s356_s22, %s356_s22, %s357_s23  }
 0x12b   :  { %353 = dma.done.wait [#allocation5], 256  }
 0x12c   :  { %354 = vsyncadd [#allocation5], 4294967040 }
 0x12d   :  { %189 = vsyncpa [#allocation4], 1 }
 0x12e   :  { %190 = vsyncpa [#allocation7], 1 }
 0x12f   :  { %191 = vsyncpa [#allocation5], 1 }

</bundles_post_ra>
